<compile_context>
chip_gen: v7x
topology: tpu7x:2x2x1
jax: 0.10.0
libtpu: 0.0.40
codegen_flags: <defaults>
</compile_context>

<pallas_src>
import jax
import jax.numpy as jnp
from jax import lax
from jax.experimental import pallas as pl
from jax.experimental.pallas import tpu as pltpu


def head_kernel(x_ref, w_ref, b_ref, o_ref):
    # x_ref: (B, C, HW)  backbone features, native NCHW with spatial flattened
    # w_ref: (OUT, C)    fc weight in original torch layout (C lane-dense)
    # b_ref: (1, OUT)    fc bias
    # o_ref: (B, OUT)    logits
    B, C, HW = x_ref.shape
    w = w_ref[...]                                   # (OUT, C)
    bias = b_ref[...]                                # (1, OUT)
    inv_hw = 1.0 / HW                                # AvgPool2d(8,1) on 8x8 == global mean
    ones_hw = jnp.ones((1, HW), dtype=jnp.float32)
    # Contract the minor (lane) dims of both operands: A @ B.T — MXU-native.
    cdims = (((1,), (1,)), ((), ()))

    rows = []
    for b in range(B):                               # B is small and static
        # Spatial sum-pool on the MXU: (1, HW) x (C, HW)^T -> (1, C)
        pooled = lax.dot_general(
            ones_hw, x_ref[b], dimension_numbers=cdims,
            preferred_element_type=jnp.float32)      # (1, C)
        # fc: (1, C) x (OUT, C)^T -> (1, OUT)
        rows.append(lax.dot_general(
            pooled, w, dimension_numbers=cdims,
            preferred_element_type=jnp.float32))     # (1, OUT)

    logits = jnp.concatenate(rows, axis=0)           # (B, OUT)
    # Fold the 1/HW pooling scale into the epilogue; bias is not scaled.
    o_ref[...] = (logits * inv_hw + bias).astype(o_ref.dtype)


def mobile_vit2_head(feats_nchw, w_fc, b_fc):
    """x = avgpool(feats); x = x.view(B, -1); x = fc(x)  — one Pallas kernel."""
    B, C, H, W = feats_nchw.shape
    assert H == 8 and W == 8, "head expects 8x8 backbone feature maps"
    assert C == w_fc.shape[1] == 1024
    out_dim = w_fc.shape[0]
    hw = H * W

    # Layout glue only: flatten spatial dims (no transpose), 2-D bias.
    x = feats_nchw.reshape(B, C, hw)                 # (B, C, HW) — native order
    b2 = b_fc.reshape(1, out_dim)                    # (1, OUT)

    # Single grid step: total working set (~0.5 MiB at B=2) trivially fits VMEM
    # on every TPU generation, so no batch grid / pipelining is needed.
    # (For large B, block the leading batch dim at <=32 per step to stay under
    #  v7x's smaller VMEM.)
    out = pl.pallas_call(
        head_kernel,
        out_shape=jax.ShapeDtypeStruct((B, out_dim), jnp.float32),
        in_specs=[
            pl.BlockSpec((B, C, hw), lambda: (0, 0, 0)),
            pl.BlockSpec((out_dim, C), lambda: (0, 0)),
            pl.BlockSpec((1, out_dim), lambda: (0, 0)),
        ],
        out_specs=pl.BlockSpec((B, out_dim), lambda: (0, 0)),
    )(x, w_fc, b2)
    return out


if __name__ == "__main__":
    key = jax.random.PRNGKey(0)
    k_x, k_w, k_b = jax.random.split(key, 3)

    # Backbone output shape for mobilevitv2-2.0 with 256x256 inputs: [B, 1024, 8, 8]
    B, C, H, W = 2, 1024, 8, 8
    feats = jax.random.normal(k_x, (B, C, H, W), dtype=jnp.float32)

    # Deterministic nn.Linear(1024, 6) parameters (same init bounds as PyTorch).
    bound = 1.0 / jnp.sqrt(jnp.float32(C))
    w_fc = jax.random.uniform(k_w, (6, C), minval=-bound, maxval=bound,
                              dtype=jnp.float32)
    b_fc = jax.random.uniform(k_b, (6,), minval=-bound, maxval=bound,
                              dtype=jnp.float32)

    y = jax.block_until_ready(mobile_vit2_head(feats, w_fc, b_fc))

    # Pure-JAX reference of the same head (avgpool -> flatten -> linear).
    pooled_ref = feats.reshape(B, C, H * W).mean(axis=-1)         # (B, C)
    ref = pooled_ref @ w_fc.T + b_fc                              # (B, 6)

    assert y.shape == (B, 6)
    # Tolerance covers default (non-HIGHEST) MXU matmul precision in both the
    # kernel and the reference.
    assert jnp.allclose(y, ref, rtol=5e-3, atol=1e-3)
    print("KERNEL_OK")
</pallas_src>

<mosaic_0001>
module attributes {stable_mosaic.version = 11 : i64} {
  func.func @head_kernel(%arg0: memref<2x1024x64xf32, #tpu.memory_space<vmem>>, %arg1: memref<6x1024xf32, #tpu.memory_space<vmem>>, %arg2: memref<1x6xf32, #tpu.memory_space<vmem>>, %arg3: memref<2x6xf32, #tpu.memory_space<vmem>>) attributes {dimension_semantics = [], scalar_prefetch = 0 : i64, scratch_operands = 0 : i64, tpu.core_type = #tpu.core_type<tc>} {
    %c0 = arith.constant 0 : index
    %c0_0 = arith.constant 0 : index
    %0 = vector.load %arg1[%c0, %c0_0] : memref<6x1024xf32, #tpu.memory_space<vmem>>, vector<6x1024xf32>
    %c0_1 = arith.constant 0 : index
    %c0_2 = arith.constant 0 : index
    %1 = vector.load %arg2[%c0_1, %c0_2] : memref<1x6xf32, #tpu.memory_space<vmem>>, vector<1x6xf32>
    %cst = arith.constant 1.000000e+00 : f32
    %2 = vector.broadcast %cst : f32 to vector<1x64xf32>
    %c0_3 = arith.constant 0 : index
    %c0_4 = arith.constant 0 : index
    %c0_5 = arith.constant 0 : index
    %3 = vector.load %arg0[%c0_3, %c0_4, %c0_5] : memref<2x1024x64xf32, #tpu.memory_space<vmem>>, vector<1x1024x64xf32>
    %4 = vector.shape_cast %3 : vector<1x1024x64xf32> to vector<1024x64xf32>
    %cst_6 = arith.constant dense<0.000000e+00> : vector<1x1024xf32>
    %5 = tpu.matmul %2, %4, %cst_6 {dimension_numbers = #tpu.dot_dimension_numbers<[1], [1], [0], [0], [0, 0, 1, 0], [], []>} : vector<1x64xf32>, vector<1024x64xf32>, vector<1x1024xf32> -> vector<1x1024xf32>
    %cst_7 = arith.constant dense<0.000000e+00> : vector<1x6xf32>
    %6 = tpu.matmul %5, %0, %cst_7 {dimension_numbers = #tpu.dot_dimension_numbers<[1], [1], [0], [0], [0, 0, 1, 0], [], []>} : vector<1x1024xf32>, vector<6x1024xf32>, vector<1x6xf32> -> vector<1x6xf32>
    %c1 = arith.constant 1 : index
    %c0_8 = arith.constant 0 : index
    %c0_9 = arith.constant 0 : index
    %7 = vector.load %arg0[%c1, %c0_8, %c0_9] : memref<2x1024x64xf32, #tpu.memory_space<vmem>>, vector<1x1024x64xf32>
    %8 = vector.shape_cast %7 : vector<1x1024x64xf32> to vector<1024x64xf32>
    %cst_10 = arith.constant dense<0.000000e+00> : vector<1x1024xf32>
    %9 = tpu.matmul %2, %8, %cst_10 {dimension_numbers = #tpu.dot_dimension_numbers<[1], [1], [0], [0], [0, 0, 1, 0], [], []>} : vector<1x64xf32>, vector<1024x64xf32>, vector<1x1024xf32> -> vector<1x1024xf32>
    %cst_11 = arith.constant dense<0.000000e+00> : vector<1x6xf32>
    %10 = tpu.matmul %9, %0, %cst_11 {dimension_numbers = #tpu.dot_dimension_numbers<[1], [1], [0], [0], [0, 0, 1, 0], [], []>} : vector<1x1024xf32>, vector<6x1024xf32>, vector<1x6xf32> -> vector<1x6xf32>
    %11 = tpu.concatenate %6, %10 in 0 : vector<1x6xf32>, vector<1x6xf32> -> vector<2x6xf32>
    %cst_12 = arith.constant 1.562500e-02 : f32
    %12 = vector.broadcast %cst_12 : f32 to vector<2x6xf32>
    %13 = arith.mulf %11, %12 : vector<2x6xf32>
    %14 = vector.broadcast %1 : vector<1x6xf32> to vector<2x6xf32>
    %15 = arith.addf %13, %14 : vector<2x6xf32>
    %c0_13 = arith.constant 0 : index
    %c0_14 = arith.constant 0 : index
    %16 = vector.load %arg3[%c0_13, %c0_14] : memref<2x6xf32, #tpu.memory_space<vmem>>, vector<2x6xf32>
    tpu.vector_store %arg3[%c0_13, %c0_14], %15 {strides = array<i32>} : memref<2x6xf32, #tpu.memory_space<vmem>>, vector<2x6xf32>,
    return
  }
}

</mosaic_0001>

<bundles_post_ra>
// kernel: tpu_custom_call.1
= control target key start
LH: loop header
LB: loop body
LE: loop exit
PB: predicated region body
PF: predicated region fallthrough
CT: control target
= control target key end

     0   :  { %vm152_vm0 = vcmask 523264   ;;  %v3297_v7 = vmov 1.0   ;;  %s4452_s0 = inlined_call_operand.vmem [shape: f32[2,1024,64], index: 0, kind: input, shape index: {}]   ;;  %s4453_s1 = inlined_call_operand.vmem [shape: f32[6,1024], index: 1, kind: input, shape index: {}]   ;;  %s4454_s2 = inlined_call_operand.vmem [shape: f32[1,6], index: 2, kind: input, shape index: {}]   ;;  %s4455_s3 = inlined_call_operand.hbm [shape: f32[2,6], index: 3, kind: output, shape index: {}]  }
   0x1   :  { %v40_v0 = vld [vmem:[%s4452_s0 + $0x80] sm:$0xff]  ;;  %v41_v1 = vld [vmem:[%s4452_s0 + $0x88] sm:$0xff]  ;;  %vm3330_vm1 = vmpackc.low %vm152_vm0, %vm152_vm0  ;;  %2635 = vmatprep.mubr.msk.f32.mxu0 %vm152_vm0, %v3297_v7  ;;  %2669 = vmatprep.mubr.msk.f32.mxu1 %vm152_vm0, %v3297_v7 }
   0x2   :  { %v24_v2 = vld [vmem:[%s4452_s0] sm:$0xff]  ;;  %v2875_v3 = vpack.c.bf16 %v41_v1, %v40_v0  ;;  %v25_v5 = vld [vmem:[%s4452_s0 + $0x8] sm:$0xff]  ;;  %v42_v10 = vld [vmem:[%s4452_s0 + $0x90] sm:$0xff] }
   0x3   :  { %v72_v6 = vld [vmem:[%s4452_s0 + $0x180] sm:$0xff]  ;;  %v2878_v8 = vpack.c.bf16 %v25_v5, %v24_v2  ;;  %v73_v9 = vld [vmem:[%s4452_s0 + $0x188] sm:$0xff]  ;;  %v43_v11 = vld [vmem:[%s4452_s0 + $0x98] sm:$0xff] }
   0x4   :  { %2877 = vmatprep.subr.msk.bf16.mxu0 %vm3330_vm1, %v2875_v3  ;;  %v2923_v12 = vpack.c.bf16 %v73_v9, %v72_v6  ;;  %v2881_v13 = vpack.c.bf16 %v43_v11, %v42_v10  ;;  %v56_v14 = vld [vmem:[%s4452_s0 + $0x100] sm:$0xff]  ;;  %v57_v15 = vld [vmem:[%s4452_s0 + $0x108] sm:$0xff]  ;;  %v74_v17 = vld [vmem:[%s4452_s0 + $0x190] sm:$0xff] }
   0x5   :  { %2880 = vmatpush3.bf16.xpose.msk.msra.mxu0 %vm3330_vm1, %v2878_v8  ;;  %v2926_v16 = vpack.c.bf16 %v57_v15, %v56_v14  ;;  %v75_v18 = vld [vmem:[%s4452_s0 + $0x198] sm:$0xff]  ;;  %v26_v19 = vld [vmem:[%s4452_s0 + $0x10] sm:$0xff]  ;;  %v44_v22 = vld [vmem:[%s4452_s0 + $0xa0] sm:$0xff] }
   0x6   :  { %2925 = vmatprep.subr.msk.bf16.mxu1 %vm3330_vm1, %v2923_v12  ;;  %2883 = vmatprep.subr.msk.bf16.mxu0 %vm3330_vm1, %v2881_v13  ;;  %v27_v20 = vld [vmem:[%s4452_s0 + $0x18] sm:$0xff]  ;;  %v2929_v21 = vpack.c.bf16 %v75_v18, %v74_v17  ;;  %v45_v23 = vld [vmem:[%s4452_s0 + $0xa8] sm:$0xff]  ;;  %v58_v24 = vld [vmem:[%s4452_s0 + $0x110] sm:$0xff] }
   0x7   :  { %2928 = vmatpush3.bf16.xpose.msk.msra.mxu1 %vm3330_vm1, %v2926_v16  ;;  %v59_v25 = vld [vmem:[%s4452_s0 + $0x118] sm:$0xff]  ;;  %v2884_v26 = vpack.c.bf16 %v27_v20, %v26_v19  ;;  %v76_v27 = vld [vmem:[%s4452_s0 + $0x1a0] sm:$0xff]  ;;  %v77_v28 = vld [vmem:[%s4452_s0 + $0x1a8] sm:$0xff]  ;;  %v2887_v29 = vpack.c.bf16 %v45_v23, %v44_v22 }
   0x8   :  { %2931 = vmatprep.subr.msk.bf16.mxu1 %vm3330_vm1, %v2929_v21  ;;  %v2932_v30 = vpack.c.bf16 %v59_v25, %v58_v24  ;;  %v2935_v31 = vpack.c.bf16 %v77_v28, %v76_v27  ;;  %v28_v32 = vld [vmem:[%s4452_s0 + $0x20] sm:$0xff]  ;;  %v29_v33 = vld [vmem:[%s4452_s0 + $0x28] sm:$0xff]  ;;  %v46_v34 = vld [vmem:[%s4452_s0 + $0xb0] sm:$0xff] }
   0x9   :  { %v47_v35 = vld [vmem:[%s4452_s0 + $0xb8] sm:$0xff]  ;;  %v60_v36 = vld [vmem:[%s4452_s0 + $0x120] sm:$0xff]  ;;  %v61_v37 = vld [vmem:[%s4452_s0 + $0x128] sm:$0xff]  ;;  %v2890_v38 = vpack.c.bf16 %v29_v33, %v28_v32 }
   0xa   :  { %v78_v39 = vld [vmem:[%s4452_s0 + $0x1b0] sm:$0xff]  ;;  %v79_v40 = vld [vmem:[%s4452_s0 + $0x1b8] sm:$0xff]  ;;  %v2893_v41 = vpack.c.bf16 %v47_v35, %v46_v34  ;;  %v2938_v42 = vpack.c.bf16 %v61_v37, %v60_v36  ;;  %v48_v46 = vld [vmem:[%s4452_s0 + $0xc0] sm:$0xff] }
   0xb   :  { %v2941_v43 = vpack.c.bf16 %v79_v40, %v78_v39  ;;  %v30_v44 = vld [vmem:[%s4452_s0 + $0x30] sm:$0xff]  ;;  %v31_v45 = vld [vmem:[%s4452_s0 + $0x38] sm:$0xff]  ;;  %v49_v47 = vld [vmem:[%s4452_s0 + $0xc8] sm:$0xff] }
   0xc   :  { %v62_v48 = vld [vmem:[%s4452_s0 + $0x130] sm:$0xff]  ;;  %v63_v49 = vld [vmem:[%s4452_s0 + $0x138] sm:$0xff]  ;;  %v2896_v50 = vpack.c.bf16 %v31_v45, %v30_v44  ;;  %v80_v51 = vld [vmem:[%s4452_s0 + $0x1c0] sm:$0xff]  ;;  %v2899_v53 = vpack.c.bf16 %v49_v47, %v48_v46 }
   0xd   :  { %2886 = vmatpush3.bf16.xpose.msk.msra.mxu0 %vm3330_vm1, %v2884_v26  ;;  %v81_v52 = vld [vmem:[%s4452_s0 + $0x1c8] sm:$0xff]  ;;  %v2944_v54 = vpack.c.bf16 %v63_v49, %v62_v48  ;;  %v32_v56 = vld [vmem:[%s4452_s0 + $0x40] sm:$0xff]  ;;  %v50_v58 = vld [vmem:[%s4452_s0 + $0xd0] sm:$0xff] }
   0xe   :  { %2889 = vmatprep.subr.msk.bf16.mxu0 %vm3330_vm1, %v2887_v29  ;;  %v2947_v55 = vpack.c.bf16 %v81_v52, %v80_v51  ;;  %v33_v57 = vld [vmem:[%s4452_s0 + $0x48] sm:$0xff]  ;;  %v51_v59 = vld [vmem:[%s4452_s0 + $0xd8] sm:$0xff]  ;;  %v64_v60 = vld [vmem:[%s4452_s0 + $0x140] sm:$0xff] }
   0xf   :  { %2934 = vmatpush3.bf16.xpose.msk.msra.mxu1 %vm3330_vm1, %v2932_v30  ;;  %v65_v61 = vld [vmem:[%s4452_s0 + $0x148] sm:$0xff]  ;;  %v2902_v62 = vpack.c.bf16 %v33_v57, %v32_v56  ;;  %v82_v63 = vld [vmem:[%s4452_s0 + $0x1d0] sm:$0xff]  ;;  %v83_v0 = vld [vmem:[%s4452_s0 + $0x1d8] sm:$0xff]  ;;  %v2905_v1 = vpack.c.bf16 %v51_v59, %v50_v58 }
  0x10   :  { %2937 = vmatprep.subr.msk.bf16.mxu1 %vm3330_vm1, %v2935_v31  ;;  %v2950_v2 = vpack.c.bf16 %v65_v61, %v64_v60  ;;  %v2953_v3 = vpack.c.bf16 %v83_v0, %v82_v63  ;;  %v34_v5 = vld [vmem:[%s4452_s0 + $0x50] sm:$0xff]  ;;  %v35_v6 = vld [vmem:[%s4452_s0 + $0x58] sm:$0xff]  ;;  %v52_v8 = vld [vmem:[%s4452_s0 + $0xe0] sm:$0xff] }
  0x11   :  { %v53_v9 = vld [vmem:[%s4452_s0 + $0xe8] sm:$0xff]  ;;  %v66_v10 = vld [vmem:[%s4452_s0 + $0x150] sm:$0xff]  ;;  %v67_v11 = vld [vmem:[%s4452_s0 + $0x158] sm:$0xff]  ;;  %v2908_v12 = vpack.c.bf16 %v35_v6, %v34_v5 }
  0x12   :  { %v84_v13 = vld [vmem:[%s4452_s0 + $0x1e0] sm:$0xff]  ;;  %v85_v14 = vld [vmem:[%s4452_s0 + $0x1e8] sm:$0xff]  ;;  %v2911_v15 = vpack.c.bf16 %v53_v9, %v52_v8  ;;  %v2956_v16 = vpack.c.bf16 %v67_v11, %v66_v10 }
  0x13   :  { %v2959_v17 = vpack.c.bf16 %v85_v14, %v84_v13 }
  0x15   :  { %2892 = vmatpush3.bf16.xpose.msk.msra.mxu0 %vm3330_vm1, %v2890_v38 }
  0x16   :  { %2895 = vmatprep.subr.msk.bf16.mxu0 %vm3330_vm1, %v2893_v41 }
  0x17   :  { %2940 = vmatpush3.bf16.xpose.msk.msra.mxu1 %vm3330_vm1, %v2938_v42 }
  0x18   :  { %2943 = vmatprep.subr.msk.bf16.mxu1 %vm3330_vm1, %v2941_v43 }
  0x1d   :  { %2898 = vmatpush3.bf16.xpose.msk.msra.mxu0 %vm3330_vm1, %v2896_v50 }
  0x1e   :  { %2901 = vmatprep.subr.msk.bf16.mxu0 %vm3330_vm1, %v2899_v53 }
  0x1f   :  { %2946 = vmatpush3.bf16.xpose.msk.msra.mxu1 %vm3330_vm1, %v2944_v54 }
  0x20   :  { %2949 = vmatprep.subr.msk.bf16.mxu1 %vm3330_vm1, %v2947_v55 }
  0x25   :  { %2904 = vmatpush3.bf16.xpose.msk.msra.mxu0 %vm3330_vm1, %v2902_v62 }
  0x26   :  { %2907 = vmatprep.subr.msk.bf16.mxu0 %vm3330_vm1, %v2905_v1 }
  0x27   :  { %2952 = vmatpush3.bf16.xpose.msk.msra.mxu1 %vm3330_vm1, %v2950_v2 }
  0x28   :  { %2955 = vmatprep.subr.msk.bf16.mxu1 %vm3330_vm1, %v2953_v3 }
  0x29   :  { %8 = vsyncpa [#allocation3], 0  ;;  %v36_v18 = vld [vmem:[%s4452_s0 + $0x60] sm:$0xff]  ;;  %v37_v19 = vld [vmem:[%s4452_s0 + $0x68] sm:$0xff]  ;;  %vm2184_vm2 = vcmask 1040384   ;;  %s3298_s23 = smov [#allocation2]  }
  0x2a   :  { %v54_v20 = vld [vmem:[%s4452_s0 + $0xf0] sm:$0xff]  ;;  %v55_v21 = vld [vmem:[%s4452_s0 + $0xf8] sm:$0xff]  ;;  %v68_v22 = vld [vmem:[%s4452_s0 + $0x160] sm:$0xff]  ;;  %v2914_v24 = vpack.c.bf16 %v37_v19, %v36_v18  ;;  %s2202_s24 = sshll.u32 %s3298_s23, 4  ;;  %vm2194_vm3 = vcmask 41984   ;;  %s2203_s24 = int_to_ptr.vmem [resolvable:$true] %s2202_s24 }
  0x2b   :  { %v69_v23 = vld [vmem:[%s4452_s0 + $0x168] sm:$0xff]  ;;  %v86_v25 = vld [vmem:[%s4452_s0 + $0x1f0] sm:$0xff]  ;;  %v87_v26 = vld [vmem:[%s4452_s0 + $0x1f8] sm:$0xff]  ;;  %v2917_v27 = vpack.c.bf16 %v55_v21, %v54_v20  ;;  %s3273_s25 = scalar_lea.vmem %s2203_s24, 32  ;;  %p3278_p1 = scmp.lt.s32.totalorder %s2203_s24, %s2203_s24 }
  0x2c   :  { %v2962_v28 = vpack.c.bf16 %v69_v23, %v68_v22  ;;  %v2965_v29 = vpack.c.bf16 %v87_v26, %v86_v25  ;;  %v38_v30 = vld [vmem:[%s4452_s0 + $0x70] sm:$0xff]  ;;  %v39_v31 = vld [vmem:[%s4452_s0 + $0x78] sm:$0xff]  ;;  %v104_v32 = vld [vmem:[%s4452_s0 + $0x280] sm:$0xff]  ;;  %p3274_p0 = scmp.ne.s32.totalorder %s2203_s24, %s3273_s25  ;;  %p3279_p2 = scmp.lt.s32.totalorder %s3273_s25, %s3273_s25 }
  0x2d   :  { %2910 = vmatpush3.bf16.xpose.msk.msra.mxu0 %vm3330_vm1, %v2908_v12  ;;  %v105_v33 = vld [vmem:[%s4452_s0 + $0x288] sm:$0xff]  ;;  %v70_v34 = vld [vmem:[%s4452_s0 + $0x170] sm:$0xff]  ;;  %v71_v35 = vld [vmem:[%s4452_s0 + $0x178] sm:$0xff]  ;;  %v2920_v36 = vpack.c.bf16 %v39_v31, %v38_v30 }
  0x2e   :  { %2913 = vmatprep.subr.msk.bf16.mxu0 %vm3330_vm1, %v2911_v15  ;;  %v136_v37 = vld [vmem:[%s4452_s0 + $0x380] sm:$0xff]  ;;  %v137_v38 = vld [vmem:[%s4452_s0 + $0x388] sm:$0xff]  ;;  %v2971_v39 = vpack.c.bf16 %v105_v33, %v104_v32  ;;  %v2968_v40 = vpack.c.bf16 %v71_v35, %v70_v34  ;;  %v106_v44 = vld [vmem:[%s4452_s0 + $0x290] sm:$0xff]  ;;  %p3280_p3 = por %p3279_p2, %p3278_p1 }
  0x2f   :  { %2958 = vmatpush3.bf16.xpose.msk.msra.mxu1 %vm3330_vm1, %v2956_v16  ;;  %v3019_v41 = vpack.c.bf16 %v137_v38, %v136_v37  ;;  %v88_v42 = vld [vmem:[%s4452_s0 + $0x200] sm:$0xff]  ;;  %v89_v43 = vld [vmem:[%s4452_s0 + $0x208] sm:$0xff]  ;;  %v107_v45 = vld [vmem:[%s4452_s0 + $0x298] sm:$0xff] }
  0x30   :  { %2961 = vmatprep.subr.msk.bf16.mxu1 %vm3330_vm1, %v2959_v17  ;;  %v120_v46 = vld [vmem:[%s4452_s0 + $0x300] sm:$0xff]  ;;  %v121_v47 = vld [vmem:[%s4452_s0 + $0x308] sm:$0xff]  ;;  %v2974_v48 = vpack.c.bf16 %v89_v43, %v88_v42  ;;  %v138_v49 = vld [vmem:[%s4452_s0 + $0x390] sm:$0xff]  ;;  %v2977_v51 = vpack.c.bf16 %v107_v45, %v106_v44  ;;  %p3281_p4 = pnand %p3280_p3, %p3274_p0 }
  0x31   :  { %v139_v50 = vld [vmem:[%s4452_s0 + $0x398] sm:$0xff]  ;;  %v3022_v52 = vpack.c.bf16 %v121_v47, %v120_v46  ;;  %v90_v54 = vld [vmem:[%s4452_s0 + $0x210] sm:$0xff]  ;;  %v108_v56 = vld [vmem:[%s4452_s0 + $0x2a0] sm:$0xff] }
  0x32   :  { %v3025_v53 = vpack.c.bf16 %v139_v50, %v138_v49  ;;  %v91_v55 = vld [vmem:[%s4452_s0 + $0x218] sm:$0xff]  ;;  %v109_v57 = vld [vmem:[%s4452_s0 + $0x2a8] sm:$0xff]  ;;  %v122_v58 = vld [vmem:[%s4452_s0 + $0x310] sm:$0xff] }
  0x33   :  { %v123_v59 = vld [vmem:[%s4452_s0 + $0x318] sm:$0xff]  ;;  %v2980_v60 = vpack.c.bf16 %v91_v55, %v90_v54  ;;  %v140_v61 = vld [vmem:[%s4452_s0 + $0x3a0] sm:$0xff]  ;;  %v141_v62 = vld [vmem:[%s4452_s0 + $0x3a8] sm:$0xff]  ;;  %v2983_v63 = vpack.c.bf16 %v109_v57, %v108_v56 }
  0x34   :  { %v3028_v0 = vpack.c.bf16 %v123_v59, %v122_v58  ;;  %v3031_v1 = vpack.c.bf16 %v141_v62, %v140_v61  ;;  %v92_v2 = vld [vmem:[%s4452_s0 + $0x220] sm:$0xff]  ;;  %v93_v3 = vld [vmem:[%s4452_s0 + $0x228] sm:$0xff]  ;;  %v110_v5 = vld [vmem:[%s4452_s0 + $0x2b0] sm:$0xff] }
  0x35   :  { %2916 = vmatpush3.bf16.xpose.msk.msra.mxu0 %vm3330_vm1, %v2914_v24  ;;  %v111_v6 = vld [vmem:[%s4452_s0 + $0x2b8] sm:$0xff]  ;;  %v124_v8 = vld [vmem:[%s4452_s0 + $0x320] sm:$0xff]  ;;  %v125_v9 = vld [vmem:[%s4452_s0 + $0x328] sm:$0xff]  ;;  %v2986_v10 = vpack.c.bf16 %v93_v3, %v92_v2 }
  0x36   :  { %2919 = vmatprep.subr.msk.bf16.mxu0 %vm3330_vm1, %v2917_v27  ;;  %v142_v11 = vld [vmem:[%s4452_s0 + $0x3b0] sm:$0xff]  ;;  %v143_v12 = vld [vmem:[%s4452_s0 + $0x3b8] sm:$0xff]  ;;  %v2989_v13 = vpack.c.bf16 %v111_v6, %v110_v5  ;;  %v3034_v14 = vpack.c.bf16 %v125_v9, %v124_v8  ;;  %v112_v18 = vld [vmem:[%s4452_s0 + $0x2c0] sm:$0xff] }
  0x37   :  { %2964 = vmatpush3.bf16.xpose.msk.msra.mxu1 %vm3330_vm1, %v2962_v28  ;;  %v3037_v15 = vpack.c.bf16 %v143_v12, %v142_v11  ;;  %v94_v16 = vld [vmem:[%s4452_s0 + $0x230] sm:$0xff]  ;;  %v95_v17 = vld [vmem:[%s4452_s0 + $0x238] sm:$0xff]  ;;  %v113_v19 = vld [vmem:[%s4452_s0 + $0x2c8] sm:$0xff] }
  0x38   :  { %2967 = vmatprep.subr.msk.bf16.mxu1 %vm3330_vm1, %v2965_v29  ;;  %v126_v20 = vld [vmem:[%s4452_s0 + $0x330] sm:$0xff]  ;;  %v127_v21 = vld [vmem:[%s4452_s0 + $0x338] sm:$0xff]  ;;  %v2992_v22 = vpack.c.bf16 %v95_v17, %v94_v16  ;;  %v144_v23 = vld [vmem:[%s4452_s0 + $0x3c0] sm:$0xff]  ;;  %v2995_v25 = vpack.c.bf16 %v113_v19, %v112_v18 }
  0x39   :  { %v145_v24 = vld [vmem:[%s4452_s0 + $0x3c8] sm:$0xff]  ;;  %v3040_v26 = vpack.c.bf16 %v127_v21, %v126_v20  ;;  %v96_v28 = vld [vmem:[%s4452_s0 + $0x240] sm:$0xff]  ;;  %v114_v30 = vld [vmem:[%s4452_s0 + $0x2d0] sm:$0xff] }
  0x3a   :  { %v3043_v27 = vpack.c.bf16 %v145_v24, %v144_v23  ;;  %v97_v29 = vld [vmem:[%s4452_s0 + $0x248] sm:$0xff]  ;;  %v115_v31 = vld [vmem:[%s4452_s0 + $0x2d8] sm:$0xff]  ;;  %v128_v32 = vld [vmem:[%s4452_s0 + $0x340] sm:$0xff] }
  0x3b   :  { %v129_v33 = vld [vmem:[%s4452_s0 + $0x348] sm:$0xff]  ;;  %v2998_v34 = vpack.c.bf16 %v97_v29, %v96_v28  ;;  %v146_v35 = vld [vmem:[%s4452_s0 + $0x3d0] sm:$0xff]  ;;  %v3001_v37 = vpack.c.bf16 %v115_v31, %v114_v30  ;;  %v116_v42 = vld [vmem:[%s4452_s0 + $0x2e0] sm:$0xff] }
  0x3c   :  { %v3046_v38 = vpack.c.bf16 %v129_v33, %v128_v32  ;;  %v117_v43 = vld [vmem:[%s4452_s0 + $0x2e8] sm:$0xff]  ;;  %v130_v44 = vld [vmem:[%s4452_s0 + $0x350] sm:$0xff]  ;;  %v131_v45 = vld [vmem:[%s4452_s0 + $0x358] sm:$0xff] }
  0x3d   :  { %2922 = vmatpush3.bf16.xpose.msk.msra.mxu0 %vm3330_vm1, %v2920_v36  ;;  %v147_v36 = vld [vmem:[%s4452_s0 + $0x3d8] sm:$0xff]  ;;  %v148_v47 = vld [vmem:[%s4452_s0 + $0x3e0] sm:$0xff]  ;;  %v3007_v49 = vpack.c.bf16 %v117_v43, %v116_v42  ;;  %v3052_v50 = vpack.c.bf16 %v131_v45, %v130_v44  ;;  %v118_v54 = vld [vmem:[%s4452_s0 + $0x2f0] sm:$0xff] }
  0x3e   :  { %2973 = vmatprep.subr.msk.bf16.mxu0 %vm3330_vm1, %v2971_v39  ;;  %v3049_v39 = vpack.c.bf16 %v147_v36, %v146_v35  ;;  %v119_v55 = vld [vmem:[%s4452_s0 + $0x2f8] sm:$0xff]  ;;  %v132_v56 = vld [vmem:[%s4452_s0 + $0x360] sm:$0xff]  ;;  %v133_v57 = vld [vmem:[%s4452_s0 + $0x368] sm:$0xff] }
  0x3f   :  { %2970 = vmatpush3.bf16.xpose.msk.msra.mxu1 %vm3330_vm1, %v2968_v40  ;;  %v98_v40 = vld [vmem:[%s4452_s0 + $0x250] sm:$0xff]  ;;  %v3013_v61 = vpack.c.bf16 %v119_v55, %v118_v54  ;;  %v3058_v62 = vpack.c.bf16 %v133_v57, %v132_v56  ;;  %v135_v3 = vld [vmem:[%s4452_s0 + $0x378] sm:$0xff]  ;;  %v3848_v8 = vld [vmem:[%s4453_s1 + $0x8] sm:$0x3f] }
  0x40   :  { %3021 = vmatprep.subr.msk.bf16.mxu1 %vm3330_vm1, %v3019_v41  ;;  %v99_v41 = vld [vmem:[%s4452_s0 + $0x258] sm:$0xff]  ;;  %v150_v59 = vld [vmem:[%s4452_s0 + $0x3f0] sm:$0xff]  ;;  %v3864_v9 = vld [vmem:[%s4453_s1] sm:$0x3f] }
  0x41   :  { %v3004_v46 = vpack.c.bf16 %v99_v41, %v98_v40  ;;  %v134_v2 = vld [vmem:[%s4452_s0 + $0x370] sm:$0xff]  ;;  %v2358_v11 = vld [vmem:[%s4452_s0 + $0x480] sm:$0xff]  ;;  %v2359_v12 = vld [vmem:[%s4452_s0 + $0x488] sm:$0xff] }
  0x42   :  { %v3064_v6 = vpack.c.bf16 %v135_v3, %v134_v2  ;;  %v2360_v17 = vld [vmem:[%s4452_s0 + $0x490] sm:$0xff]  ;;  %v2361_v18 = vld [vmem:[%s4452_s0 + $0x498] sm:$0xff]  ;;  %v2362_v23 = vld [vmem:[%s4452_s0 + $0x4a0] sm:$0xff] }
  0x43   :  { %v2344_v19 = vld [vmem:[%s4452_s0 + $0x410] sm:$0xff]  ;;  %v3073_v20 = vpack.c.bf16 %v2361_v18, %v2360_v17  ;;  %v2345_v21 = vld [vmem:[%s4452_s0 + $0x418] sm:$0xff]  ;;  %v2363_v24 = vld [vmem:[%s4452_s0 + $0x4a8] sm:$0xff] }
  0x44   :  { %2636 = vmatmul.mubr.msk.f32.vlgmr.msra.gmra.mrb[0].mxu0 %vm152_vm0, %v3297_v7  ;;  %v2364_v29 = vld [vmem:[%s4452_s0 + $0x4b0] sm:$0xff]  ;;  %v2365_v30 = vld [vmem:[%s4452_s0 + $0x4b8] sm:$0xff]  ;;  %v2366_v35 = vld [vmem:[%s4452_s0 + $0x4c0] sm:$0xff] }
  0x45   :  { %2976 = vmatpush3.bf16.xpose.msk.msra.mxu0 %vm3330_vm1, %v2974_v48  ;;  %2703 = vmatprep.mubr.msk.f32.mxu0 %vm152_vm0, %v3297_v7  ;;  %v149_v48 = vld [vmem:[%s4452_s0 + $0x3e8] sm:$0xff]  ;;  %v2348_v31 = vld [vmem:[%s4452_s0 + $0x430] sm:$0xff]  ;;  %v3085_v32 = vpack.c.bf16 %v2365_v30, %v2364_v29  ;;  %v2349_v33 = vld [vmem:[%s4452_s0 + $0x438] sm:$0xff] }
  0x46   :  { %2670 = vmatmul.mubr.msk.f32.vlgmr.msra.gmra.mrb[0].mxu1 %vm152_vm0, %v3297_v7  ;;  %2979 = vmatprep.subr.msk.bf16.mxu0 %vm3330_vm1, %v2977_v51  ;;  %v3055_v51 = vpack.c.bf16 %v149_v48, %v148_v47  ;;  %v2367_v36 = vld [vmem:[%s4452_s0 + $0x4c8] sm:$0xff]  ;;  %v2368_v41 = vld [vmem:[%s4452_s0 + $0x4d0] sm:$0xff]  ;;  %v2369_v42 = vld [vmem:[%s4452_s0 + $0x4d8] sm:$0xff] }
  0x47   :  { %3024 = vmatpush3.bf16.xpose.msk.msra.mxu1 %vm3330_vm1, %v3022_v52  ;;  %2737 = vmatprep.mubr.msk.f32.mxu1 %vm152_vm0, %v3297_v7  ;;  %v100_v52 = vld [vmem:[%s4452_s0 + $0x260] sm:$0xff]  ;;  %v2352_v43 = vld [vmem:[%s4452_s0 + $0x450] sm:$0xff]  ;;  %v3097_v44 = vpack.c.bf16 %v2369_v42, %v2368_v41  ;;  %v2353_v45 = vld [vmem:[%s4452_s0 + $0x458] sm:$0xff] }
  0x48   :  { %3027 = vmatprep.subr.msk.bf16.mxu1 %vm3330_vm1, %v3025_v53  ;;  %v101_v53 = vld [vmem:[%s4452_s0 + $0x268] sm:$0xff]  ;;  %v2370_v47 = vld [vmem:[%s4452_s0 + $0x4e0] sm:$0xff]  ;;  %v2373_v54 = vld [vmem:[%s4452_s0 + $0x4f8] sm:$0xff] }
  0x49   :  { %v3010_v58 = vpack.c.bf16 %v101_v53, %v100_v52  ;;  %v2371_v48 = vld [vmem:[%s4452_s0 + $0x4e8] sm:$0xff]  ;;  %v2372_v53 = vld [vmem:[%s4452_s0 + $0x4f0] sm:$0xff]  ;;  %v2357_v57 = vld [vmem:[%s4452_s0 + $0x478] sm:$0xff] }
  0x4a   :  { %v2356_v55 = vld [vmem:[%s4452_s0 + $0x470] sm:$0xff]  ;;  %v3109_v56 = vpack.c.bf16 %v2373_v54, %v2372_v53  ;;  %v4050_v18 = vld [vmem:[%s4453_s1 + $0x20] sm:$0x3f]  ;;  %v2413_v30 = vld [vmem:[%s4452_s0 + $0x638] sm:$0xff] }
  0x4b   :  { %v4020_v3 = vld [vmem:[%s4453_s1 + $0x10] sm:$0x3f]  ;;  %v2417_v42 = vld [vmem:[%s4452_s0 + $0x658] sm:$0xff] }
  0x4c   :  { %v2421_v54 = vld [vmem:[%s4452_s0 + $0x678] sm:$0xff] }
  0x4d   :  { %2982 = vmatpush3.bf16.xpose.msk.msra.mxu0 %vm3330_vm1, %v2980_v60  ;;  %v151_v60 = vld [vmem:[%s4452_s0 + $0x3f8] sm:$0xff] }
  0x4e   :  { %2985 = vmatprep.subr.msk.bf16.mxu0 %vm3330_vm1, %v2983_v63  ;;  %v3061_v63 = vpack.c.bf16 %v151_v60, %v150_v59  ;;  %v2422_v59 = vld [vmem:[%s4452_s0 + $0x680] sm:$0xff]  ;;  %v2423_v60 = vld [vmem:[%s4452_s0 + $0x688] sm:$0xff] }
  0x4f   :  { %3030 = vmatpush3.bf16.xpose.msk.msra.mxu1 %vm3330_vm1, %v3028_v0  ;;  %v102_v0 = vld [vmem:[%s4452_s0 + $0x270] sm:$0xff] }
  0x50   :  { %3033 = vmatprep.subr.msk.bf16.mxu1 %vm3330_vm1, %v3031_v1  ;;  %v103_v1 = vld [vmem:[%s4452_s0 + $0x278] sm:$0xff] }
  0x51   :  { %v3016_v5 = vpack.c.bf16 %v103_v1, %v102_v0 }
  0x55   :  { %2988 = vmatpush3.bf16.xpose.msk.msra.mxu0 %vm3330_vm1, %v2986_v10  ;;  %v3870_v10 = vld [vmem:[%s4453_s1 + $0x18] sm:$0x3f] }
  0x56   :  { %2991 = vmatprep.subr.msk.bf16.mxu0 %vm3330_vm1, %v2989_v13  ;;  %v3067_v13 = vpack.c.bf16 %v2359_v12, %v2358_v11  ;;  %v2424_v12 = vld [vmem:[%s4452_s0 + $0x690] sm:$0xff] }
  0x57   :  { %3036 = vmatpush3.bf16.xpose.msk.msra.mxu1 %vm3330_vm1, %v3034_v14  ;;  %v2342_v14 = vld [vmem:[%s4452_s0 + $0x400] sm:$0xff] }
  0x58   :  { %3039 = vmatprep.subr.msk.bf16.mxu1 %vm3330_vm1, %v3037_v15  ;;  %v2343_v15 = vld [vmem:[%s4452_s0 + $0x408] sm:$0xff] }
  0x59   :  { %v3070_v16 = vpack.c.bf16 %v2343_v15, %v2342_v14  ;;  %v2408_v14 = vld [vmem:[%s4452_s0 + $0x610] sm:$0xff] }
  0x5d   :  { %2994 = vmatpush3.bf16.xpose.msk.msra.mxu0 %vm3330_vm1, %v2992_v22  ;;  %v3076_v22 = vpack.c.bf16 %v2345_v21, %v2344_v19  ;;  %v4057_v19 = vld [vmem:[%s4453_s1 + $0x38] sm:$0x3f]  ;;  %v2427_v21 = vld [vmem:[%s4452_s0 + $0x6a8] sm:$0xff] }
  0x5e   :  { %2997 = vmatprep.subr.msk.bf16.mxu0 %vm3330_vm1, %v2995_v25  ;;  %v2346_v25 = vld [vmem:[%s4452_s0 + $0x420] sm:$0xff] }
  0x5f   :  { %3042 = vmatpush3.bf16.xpose.msk.msra.mxu1 %vm3330_vm1, %v3040_v26  ;;  %v3079_v26 = vpack.c.bf16 %v2363_v24, %v2362_v23  ;;  %v2411_v24 = vld [vmem:[%s4452_s0 + $0x628] sm:$0xff] }
  0x60   :  { %3045 = vmatprep.subr.msk.bf16.mxu1 %vm3330_vm1, %v3043_v27  ;;  %v2347_v27 = vld [vmem:[%s4452_s0 + $0x428] sm:$0xff] }
  0x61   :  { %v3082_v28 = vpack.c.bf16 %v2347_v27, %v2346_v25  ;;  %v2429_v27 = vld [vmem:[%s4452_s0 + $0x6b8] sm:$0xff] }
  0x65   :  { %3000 = vmatpush3.bf16.xpose.msk.msra.mxu0 %vm3330_vm1, %v2998_v34  ;;  %v3088_v34 = vpack.c.bf16 %v2349_v33, %v2348_v31  ;;  %v2431_v33 = vld [vmem:[%s4452_s0 + $0x6c8] sm:$0xff] }
  0x66   :  { %3003 = vmatprep.subr.msk.bf16.mxu0 %vm3330_vm1, %v3001_v37  ;;  %v2350_v37 = vld [vmem:[%s4452_s0 + $0x440] sm:$0xff] }
  0x67   :  { %3048 = vmatpush3.bf16.xpose.msk.msra.mxu1 %vm3330_vm1, %v3046_v38  ;;  %v3091_v38 = vpack.c.bf16 %v2367_v36, %v2366_v35  ;;  %v2415_v36 = vld [vmem:[%s4452_s0 + $0x648] sm:$0xff] }
  0x68   :  { %3051 = vmatprep.subr.msk.bf16.mxu1 %vm3330_vm1, %v3049_v39  ;;  %v2351_v39 = vld [vmem:[%s4452_s0 + $0x448] sm:$0xff] }
  0x69   :  { %v3094_v40 = vpack.c.bf16 %v2351_v39, %v2350_v37  ;;  %v2433_v39 = vld [vmem:[%s4452_s0 + $0x6d8] sm:$0xff] }
  0x6d   :  { %3006 = vmatpush3.bf16.xpose.msk.msra.mxu0 %vm3330_vm1, %v3004_v46  ;;  %v3100_v46 = vpack.c.bf16 %v2353_v45, %v2352_v43  ;;  %v2435_v45 = vld [vmem:[%s4452_s0 + $0x6e8] sm:$0xff] }
  0x6e   :  { %3009 = vmatprep.subr.msk.bf16.mxu0 %vm3330_vm1, %v3007_v49  ;;  %v2354_v49 = vld [vmem:[%s4452_s0 + $0x460] sm:$0xff] }
  0x6f   :  { %3054 = vmatpush3.bf16.xpose.msk.msra.mxu1 %vm3330_vm1, %v3052_v50  ;;  %v3103_v50 = vpack.c.bf16 %v2371_v48, %v2370_v47  ;;  %v2419_v48 = vld [vmem:[%s4452_s0 + $0x668] sm:$0xff] }
  0x70   :  { %3057 = vmatprep.subr.msk.bf16.mxu1 %vm3330_vm1, %v3055_v51  ;;  %v2355_v51 = vld [vmem:[%s4452_s0 + $0x468] sm:$0xff] }
  0x71   :  { %v3106_v52 = vpack.c.bf16 %v2355_v51, %v2354_v49  ;;  %v2437_v51 = vld [vmem:[%s4452_s0 + $0x6f8] sm:$0xff] }
  0x75   :  { %3012 = vmatpush3.bf16.xpose.msk.msra.mxu0 %vm3330_vm1, %v3010_v58  ;;  %v3112_v58 = vpack.c.bf16 %v2357_v57, %v2356_v55  ;;  %v2391_v57 = vld [vmem:[%s4452_s0 + $0x588] sm:$0xff] }
  0x76   :  { %3015 = vmatprep.subr.msk.bf16.mxu0 %vm3330_vm1, %v3013_v61  ;;  %v2406_v61 = vld [vmem:[%s4452_s0 + $0x600] sm:$0xff] }
  0x77   :  { %3060 = vmatpush3.bf16.xpose.msk.msra.mxu1 %vm3330_vm1, %v3058_v62  ;;  %v3163_v62 = vpack.c.bf16 %v2423_v60, %v2422_v59  ;;  %v4169_v60 = vld [vmem:[%s4453_s1 + $0x30] sm:$0x3f] }
  0x78   :  { %3063 = vmatprep.subr.msk.bf16.mxu1 %vm3330_vm1, %v3061_v63  ;;  %v2407_v63 = vld [vmem:[%s4452_s0 + $0x608] sm:$0xff] }
  0x79   :  { %v3166_v0 = vpack.c.bf16 %v2407_v63, %v2406_v61  ;;  %v2374_v63 = vld [vmem:[%s4452_s0 + $0x500] sm:$0xff] }
  0x7d   :  { %3018 = vmatpush3.bf16.xpose.msk.msra.mxu0 %vm3330_vm1, %v3016_v5 }
  0x7e   :  { %824 = vmatprep.subr.mxu0 %v3848_v8 }
  0x7f   :  { %3066 = vmatpush3.bf16.xpose.msk.msra.mxu1 %vm3330_vm1, %v3064_v6  ;;  %v4029_v6 = vld [vmem:[%s4453_s1 + $0x28] sm:$0x3f] }
  0x80   :  { %3069 = vmatprep.subr.msk.bf16.mxu1 %vm3330_vm1, %v3067_v13  ;;  %v2425_v13 = vld [vmem:[%s4452_s0 + $0x698] sm:$0xff] }
  0x81   :  { %v3169_v15 = vpack.c.bf16 %v2425_v13, %v2424_v12  ;;  %v2394_v12 = vld [vmem:[%s4452_s0 + $0x5a0] sm:$0xff]  ;;  %v2395_v13 = vld [vmem:[%s4452_s0 + $0x5a8] sm:$0xff] }
  0x84   :  { %2704 = vmatmul.mubr.msk.f32.vlgmr.msra.gmra.mrb[2].mxu0 %vm152_vm0, %v3297_v7 }
  0x85   :  { %825 = vmatpush1.xpose.msra.mxu0 %v3864_v9 }
  0x86   :  { %2738 = vmatmul.mubr.msk.f32.vlgmr.msra.gmra.mrb[2].mxu1 %vm152_vm0, %v3297_v7  ;;  %894 = vmatprep.subr.mxu0 %v3870_v10 }
  0x87   :  { %2771 = vmatprep.mubr.msk.f32.mxu1 %vm152_vm0, %v3297_v7  ;;  %3072 = vmatpush3.bf16.xpose.msk.msra.mxu1 %vm3330_vm1, %v3070_v16  ;;  %v2409_v16 = vld [vmem:[%s4452_s0 + $0x618] sm:$0xff] }
  0x88   :  { %3075 = vmatprep.subr.msk.bf16.mxu1 %vm3330_vm1, %v3073_v20  ;;  %v3172_v17 = vpack.c.bf16 %v2409_v16, %v2408_v14  ;;  %v2426_v20 = vld [vmem:[%s4452_s0 + $0x6a0] sm:$0xff] }
  0x89   :  { %v3175_v23 = vpack.c.bf16 %v2427_v21, %v2426_v20  ;;  %v2378_v16 = vld [vmem:[%s4452_s0 + $0x520] sm:$0xff]  ;;  %v2396_v20 = vld [vmem:[%s4452_s0 + $0x5b0] sm:$0xff]  ;;  %v2397_v21 = vld [vmem:[%s4452_s0 + $0x5b8] sm:$0xff] }
  0x8f   :  { %3078 = vmatpush3.bf16.xpose.msk.msra.mxu1 %vm3330_vm1, %v3076_v22  ;;  %v2410_v22 = vld [vmem:[%s4452_s0 + $0x620] sm:$0xff] }
  0x90   :  { %3081 = vmatprep.subr.msk.bf16.mxu1 %vm3330_vm1, %v3079_v26  ;;  %v3178_v25 = vpack.c.bf16 %v2411_v24, %v2410_v22  ;;  %v2428_v26 = vld [vmem:[%s4452_s0 + $0x6b0] sm:$0xff] }
  0x91   :  { %v3181_v29 = vpack.c.bf16 %v2429_v27, %v2428_v26  ;;  %v2380_v24 = vld [vmem:[%s4452_s0 + $0x530] sm:$0xff]  ;;  %v2398_v26 = vld [vmem:[%s4452_s0 + $0x5c0] sm:$0xff]  ;;  %v2399_v27 = vld [vmem:[%s4452_s0 + $0x5c8] sm:$0xff] }
  0x97   :  { %3084 = vmatpush3.bf16.xpose.msk.msra.mxu1 %vm3330_vm1, %v3082_v28  ;;  %v2412_v28 = vld [vmem:[%s4452_s0 + $0x630] sm:$0xff] }
  0x98   :  { %3087 = vmatprep.subr.msk.bf16.mxu1 %vm3330_vm1, %v3085_v32  ;;  %v3184_v31 = vpack.c.bf16 %v2413_v30, %v2412_v28  ;;  %v2430_v32 = vld [vmem:[%s4452_s0 + $0x6c0] sm:$0xff] }
  0x99   :  { %v3187_v35 = vpack.c.bf16 %v2431_v33, %v2430_v32  ;;  %v2382_v30 = vld [vmem:[%s4452_s0 + $0x540] sm:$0xff]  ;;  %v2400_v32 = vld [vmem:[%s4452_s0 + $0x5d0] sm:$0xff]  ;;  %v2401_v33 = vld [vmem:[%s4452_s0 + $0x5d8] sm:$0xff] }
  0x9f   :  { %3090 = vmatpush3.bf16.xpose.msk.msra.mxu1 %vm3330_vm1, %v3088_v34  ;;  %v2414_v34 = vld [vmem:[%s4452_s0 + $0x640] sm:$0xff] }
  0xa0   :  { %3093 = vmatprep.subr.msk.bf16.mxu1 %vm3330_vm1, %v3091_v38  ;;  %v3190_v37 = vpack.c.bf16 %v2415_v36, %v2414_v34  ;;  %v2432_v38 = vld [vmem:[%s4452_s0 + $0x6d0] sm:$0xff] }
  0xa1   :  { %v3193_v41 = vpack.c.bf16 %v2433_v39, %v2432_v38  ;;  %v2384_v36 = vld [vmem:[%s4452_s0 + $0x550] sm:$0xff]  ;;  %v2402_v38 = vld [vmem:[%s4452_s0 + $0x5e0] sm:$0xff]  ;;  %v2403_v39 = vld [vmem:[%s4452_s0 + $0x5e8] sm:$0xff] }
  0xa7   :  { %3096 = vmatpush3.bf16.xpose.msk.msra.mxu1 %vm3330_vm1, %v3094_v40  ;;  %v2416_v40 = vld [vmem:[%s4452_s0 + $0x650] sm:$0xff] }
  0xa8   :  { %3099 = vmatprep.subr.msk.bf16.mxu1 %vm3330_vm1, %v3097_v44  ;;  %v3196_v43 = vpack.c.bf16 %v2417_v42, %v2416_v40  ;;  %v2434_v44 = vld [vmem:[%s4452_s0 + $0x6e0] sm:$0xff] }
  0xa9   :  { %v3199_v47 = vpack.c.bf16 %v2435_v45, %v2434_v44  ;;  %v2386_v42 = vld [vmem:[%s4452_s0 + $0x560] sm:$0xff]  ;;  %v2404_v44 = vld [vmem:[%s4452_s0 + $0x5f0] sm:$0xff]  ;;  %v2405_v45 = vld [vmem:[%s4452_s0 + $0x5f8] sm:$0xff] }
  0xaf   :  { %3102 = vmatpush3.bf16.xpose.msk.msra.mxu1 %vm3330_vm1, %v3100_v46  ;;  %v2418_v46 = vld [vmem:[%s4452_s0 + $0x660] sm:$0xff] }
  0xb0   :  { %3105 = vmatprep.subr.msk.bf16.mxu1 %vm3330_vm1, %v3103_v50  ;;  %v3202_v49 = vpack.c.bf16 %v2419_v48, %v2418_v46  ;;  %v2436_v50 = vld [vmem:[%s4452_s0 + $0x6f0] sm:$0xff] }
  0xb1   :  { %v3205_v53 = vpack.c.bf16 %v2437_v51, %v2436_v50  ;;  %v2388_v48 = vld [vmem:[%s4452_s0 + $0x570] sm:$0xff]  ;;  %v2454_v50 = vld [vmem:[%s4452_s0 + $0x780] sm:$0xff]  ;;  %v2455_v51 = vld [vmem:[%s4452_s0 + $0x788] sm:$0xff] }
  0xb7   :  { %3108 = vmatpush3.bf16.xpose.msk.msra.mxu1 %vm3330_vm1, %v3106_v52  ;;  %v2420_v52 = vld [vmem:[%s4452_s0 + $0x670] sm:$0xff] }
  0xb8   :  { %3111 = vmatprep.subr.msk.bf16.mxu1 %vm3330_vm1, %v3109_v56  ;;  %v3208_v55 = vpack.c.bf16 %v2421_v54, %v2420_v52  ;;  %v2390_v56 = vld [vmem:[%s4452_s0 + $0x580] sm:$0xff] }
  0xb9   :  { %v3115_v61 = vpack.c.bf16 %v2391_v57, %v2390_v56  ;;  %v2438_v54 = vld [vmem:[%s4452_s0 + $0x700] sm:$0xff]  ;;  %v2456_v56 = vld [vmem:[%s4452_s0 + $0x790] sm:$0xff]  ;;  %v2457_v57 = vld [vmem:[%s4452_s0 + $0x798] sm:$0xff] }
  0xbf   :  { %3114 = vmatpush3.bf16.xpose.msk.msra.mxu1 %vm3330_vm1, %v3112_v58 }
  0xc0   :  { %3165 = vmatprep.subr.msk.bf16.mxu1 %vm3330_vm1, %v3163_v62 }
  0xc6   :  { %2772 = vmatmul.mubr.msk.f32.vlgmr.msra.gmra.mrb[4].mxu1 %vm152_vm0, %v3297_v7 }
  0xc7   :  { %3168 = vmatpush3.bf16.xpose.msk.msra.mxu1 %vm3330_vm1, %v3166_v0  ;;  %2839 = vmatprep.mubr.msk.f32.mxu1 %vm152_vm0, %v3297_v7  ;;  %v2393_v0 = vld [vmem:[%s4452_s0 + $0x598] sm:$0xff] }
  0xc8   :  { %3171 = vmatprep.subr.msk.bf16.mxu1 %vm3330_vm1, %v3169_v15  ;;  %v3127_v15 = vpack.c.bf16 %v2395_v13, %v2394_v12  ;;  %v2444_v13 = vld [vmem:[%s4452_s0 + $0x730] sm:$0xff] }
  0xcf   :  { %3174 = vmatpush3.bf16.xpose.msk.msra.mxu1 %vm3330_vm1, %v3172_v17  ;;  %v2379_v17 = vld [vmem:[%s4452_s0 + $0x528] sm:$0xff] }
  0xd0   :  { %3177 = vmatprep.subr.msk.bf16.mxu1 %vm3330_vm1, %v3175_v23  ;;  %v3130_v22 = vpack.c.bf16 %v2379_v17, %v2378_v16  ;;  %v3133_v23 = vpack.c.bf16 %v2397_v21, %v2396_v20  ;;  %v2463_v16 = vld [vmem:[%s4452_s0 + $0x7c8] sm:$0xff]  ;;  %v2446_v21 = vld [vmem:[%s4452_s0 + $0x740] sm:$0xff] }
  0xd7   :  { %3180 = vmatpush3.bf16.xpose.msk.msra.mxu1 %vm3330_vm1, %v3178_v25  ;;  %v2381_v25 = vld [vmem:[%s4452_s0 + $0x538] sm:$0xff] }
  0xd8   :  { %3183 = vmatprep.subr.msk.bf16.mxu1 %vm3330_vm1, %v3181_v29  ;;  %v3136_v28 = vpack.c.bf16 %v2381_v25, %v2380_v24  ;;  %v3139_v29 = vpack.c.bf16 %v2399_v27, %v2398_v26  ;;  %v2465_v24 = vld [vmem:[%s4452_s0 + $0x7d8] sm:$0xff]  ;;  %v2448_v27 = vld [vmem:[%s4452_s0 + $0x750] sm:$0xff] }
  0xdf   :  { %3186 = vmatpush3.bf16.xpose.msk.msra.mxu1 %vm3330_vm1, %v3184_v31  ;;  %v2383_v31 = vld [vmem:[%s4452_s0 + $0x548] sm:$0xff] }
  0xe0   :  { %3189 = vmatprep.subr.msk.bf16.mxu1 %vm3330_vm1, %v3187_v35  ;;  %v3142_v34 = vpack.c.bf16 %v2383_v31, %v2382_v30  ;;  %v3145_v35 = vpack.c.bf16 %v2401_v33, %v2400_v32  ;;  %v2467_v30 = vld [vmem:[%s4452_s0 + $0x7e8] sm:$0xff]  ;;  %v2450_v33 = vld [vmem:[%s4452_s0 + $0x760] sm:$0xff] }
  0xe7   :  { %3192 = vmatpush3.bf16.xpose.msk.msra.mxu1 %vm3330_vm1, %v3190_v37  ;;  %v2385_v37 = vld [vmem:[%s4452_s0 + $0x558] sm:$0xff] }
  0xe8   :  { %3195 = vmatprep.subr.msk.bf16.mxu1 %vm3330_vm1, %v3193_v41  ;;  %v3148_v40 = vpack.c.bf16 %v2385_v37, %v2384_v36  ;;  %v3151_v41 = vpack.c.bf16 %v2403_v39, %v2402_v38  ;;  %v2469_v36 = vld [vmem:[%s4452_s0 + $0x7f8] sm:$0xff]  ;;  %v2452_v39 = vld [vmem:[%s4452_s0 + $0x770] sm:$0xff] }
  0xef   :  { %3198 = vmatpush3.bf16.xpose.msk.msra.mxu1 %vm3330_vm1, %v3196_v43  ;;  %v2387_v43 = vld [vmem:[%s4452_s0 + $0x568] sm:$0xff] }
  0xf0   :  { %3201 = vmatprep.subr.msk.bf16.mxu1 %vm3330_vm1, %v3199_v47  ;;  %v3154_v46 = vpack.c.bf16 %v2387_v43, %v2386_v42  ;;  %v3157_v47 = vpack.c.bf16 %v2405_v45, %v2404_v44 }
  0xf7   :  { %3204 = vmatpush3.bf16.xpose.msk.msra.mxu1 %vm3330_vm1, %v3202_v49  ;;  %v2389_v49 = vld [vmem:[%s4452_s0 + $0x578] sm:$0xff] }
  0xf8   :  { %3207 = vmatprep.subr.msk.bf16.mxu1 %vm3330_vm1, %v3205_v53  ;;  %v3160_v52 = vpack.c.bf16 %v2389_v49, %v2388_v48  ;;  %v3211_v53 = vpack.c.bf16 %v2455_v51, %v2454_v50 }
  0xff   :  { %3210 = vmatpush3.bf16.xpose.msk.msra.mxu1 %vm3330_vm1, %v3208_v55  ;;  %v2439_v55 = vld [vmem:[%s4452_s0 + $0x708] sm:$0xff] }
 0x100   :  { %1901 = vmatprep.subr.mxu1 %v3848_v8 }
 0x106   :  { %2840 = vmatmul.mubr.msk.f32.vlgmr.msra.gmra.mrb[6].mxu1 %vm152_vm0, %v3297_v7 }
 0x107   :  { %1902 = vmatpush1.xpose.msra.mxu1 %v3864_v9  ;;  %v2375_v9 = vld [vmem:[%s4452_s0 + $0x508] sm:$0xff] }
 0x108   :  { %1971 = vmatprep.subr.mxu1 %v3870_v10  ;;  %v2392_v10 = vld [vmem:[%s4452_s0 + $0x590] sm:$0xff] }
 0x117   :  { %v606_v1 = vpop.f32.mrb[0].mxu0 }
 0x118   :  { %v608_v2 = vpop.f32.mrb[1].mxu0 }
 0x119   :  { %888 = vmatprep.mubr.f32.mxu0 %v608_v2  ;;  %v677_v5 = vpop.f32.mrb[0].mxu1  ;;  %v3121_v2 = vpack.c.bf16 %v2393_v0, %v2392_v10  ;;  %v2442_v0 = vld [vmem:[%s4452_s0 + $0x720] sm:$0xff] }
 0x11a   :  { %889 = vmatmul.mubr.f32.vlgmr.msra.gmra.mrb[4].mxu0 %v606_v1  ;;  %v679_v11 = vpop.f32.mrb[1].mxu1  ;;  %v3118_v1 = vpack.c.bf16 %v2375_v9, %v2374_v63  ;;  %v2459_v63 = vld [vmem:[%s4452_s0 + $0x7a8] sm:$0xff] }
 0x11b   :  { %895 = vmatpush1.xpose.msra.mxu0 %v4020_v3  ;;  %958 = vmatprep.mubr.f32.mxu0 %v679_v11  ;;  %v2377_v11 = vld [vmem:[%s4452_s0 + $0x518] sm:$0xff] }
 0x11c   :  { %964 = vmatprep.subr.mxu0 %v4029_v6 }
 0x122   :  { %959 = vmatmul.mubr.f32.vlgmr.msra.gmra.mrb[4].mxu0 %v677_v5  ;;  %v2376_v5 = vld [vmem:[%s4452_s0 + $0x510] sm:$0xff] }
 0x123   :  { %965 = vmatpush1.xpose.msra.mxu0 %v4050_v18  ;;  %v3124_v14 = vpack.c.bf16 %v2377_v11, %v2376_v5  ;;  %v2461_v5 = vld [vmem:[%s4452_s0 + $0x7b8] sm:$0xff] }
 0x124   :  { %1034 = vmatprep.subr.mxu0 %v4057_v19 }
 0x157   :  { %v748_v58 = vpop.f32.mrb[2].mxu0 }
 0x158   :  { %v750_v59 = vpop.f32.mrb[3].mxu0 }
 0x159   :  { %1028 = vmatprep.mubr.f32.mxu0 %v750_v59  ;;  %v819_v8 = vpop.f32.mrb[2].mxu1  ;;  %v3217_v59 = vpack.c.bf16 %v2457_v57, %v2456_v56 }
 0x15a   :  { %1029 = vmatmul.mubr.f32.vlgmr.msra.gmra.mrb[4].mxu0 %v748_v58  ;;  %v821_v62 = vpop.f32.mrb[3].mxu1  ;;  %v3214_v58 = vpack.c.bf16 %v2439_v55, %v2438_v54 }
 0x15b   :  { %1035 = vmatpush1.xpose.msra.mxu0 %v4169_v60  ;;  %1098 = vmatprep.mubr.f32.mxu0 %v821_v62  ;;  %v2458_v62 = vld [vmem:[%s4452_s0 + $0x7a0] sm:$0xff] }
 0x15c   :  { %3117 = vmatprep.subr.msk.bf16.mxu0 %vm3330_vm1, %v3115_v61  ;;  %v2440_v61 = vld [vmem:[%s4452_s0 + $0x710] sm:$0xff]  ;;  %v3223_v10 = vpack.c.bf16 %v2459_v63, %v2458_v62 }
 0x162   :  { %1099 = vmatmul.mubr.f32.vlgmr.msra.gmra.mrb[4].mxu0 %v819_v8  ;;  %v2441_v8 = vld [vmem:[%s4452_s0 + $0x718] sm:$0xff] }
 0x163   :  { %3120 = vmatpush3.bf16.xpose.msk.msra.mxu0 %vm3330_vm1, %v3118_v1  ;;  %2805 = vmatprep.mubr.msk.f32.mxu0 %vm152_vm0, %v3297_v7  ;;  %v3220_v9 = vpack.c.bf16 %v2441_v8, %v2440_v61  ;;  %v2443_v1 = vld [vmem:[%s4452_s0 + $0x728] sm:$0xff] }
 0x164   :  { %3123 = vmatprep.subr.msk.bf16.mxu0 %vm3330_vm1, %v3121_v2  ;;  %v2460_v2 = vld [vmem:[%s4452_s0 + $0x7b0] sm:$0xff]  ;;  %v3226_v11 = vpack.c.bf16 %v2443_v1, %v2442_v0 }
 0x165   :  { %v3229_v12 = vpack.c.bf16 %v2461_v5, %v2460_v2 }
 0x16b   :  { %3126 = vmatpush3.bf16.xpose.msk.msra.mxu0 %vm3330_vm1, %v3124_v14  ;;  %v2445_v14 = vld [vmem:[%s4452_s0 + $0x738] sm:$0xff] }
 0x16c   :  { %3129 = vmatprep.subr.msk.bf16.mxu0 %vm3330_vm1, %v3127_v15  ;;  %v2462_v15 = vld [vmem:[%s4452_s0 + $0x7c0] sm:$0xff]  ;;  %v3232_v17 = vpack.c.bf16 %v2445_v14, %v2444_v13 }
 0x16d   :  { %v3235_v20 = vpack.c.bf16 %v2463_v16, %v2462_v15 }
 0x173   :  { %3132 = vmatpush3.bf16.xpose.msk.msra.mxu0 %vm3330_vm1, %v3130_v22  ;;  %v2447_v22 = vld [vmem:[%s4452_s0 + $0x748] sm:$0xff] }
 0x174   :  { %3135 = vmatprep.subr.msk.bf16.mxu0 %vm3330_vm1, %v3133_v23  ;;  %v2464_v23 = vld [vmem:[%s4452_s0 + $0x7d0] sm:$0xff]  ;;  %v3238_v25 = vpack.c.bf16 %v2447_v22, %v2446_v21 }
 0x175   :  { %v3241_v26 = vpack.c.bf16 %v2465_v24, %v2464_v23 }
 0x17b   :  { %3138 = vmatpush3.bf16.xpose.msk.msra.mxu0 %vm3330_vm1, %v3136_v28  ;;  %v2449_v28 = vld [vmem:[%s4452_s0 + $0x758] sm:$0xff] }
 0x17c   :  { %3141 = vmatprep.subr.msk.bf16.mxu0 %vm3330_vm1, %v3139_v29  ;;  %v2466_v29 = vld [vmem:[%s4452_s0 + $0x7e0] sm:$0xff]  ;;  %v3244_v31 = vpack.c.bf16 %v2449_v28, %v2448_v27 }
 0x17d   :  { %v3247_v32 = vpack.c.bf16 %v2467_v30, %v2466_v29 }
 0x183   :  { %3144 = vmatpush3.bf16.xpose.msk.msra.mxu0 %vm3330_vm1, %v3142_v34  ;;  %v2451_v34 = vld [vmem:[%s4452_s0 + $0x768] sm:$0xff] }
 0x184   :  { %3147 = vmatprep.subr.msk.bf16.mxu0 %vm3330_vm1, %v3145_v35  ;;  %v2468_v35 = vld [vmem:[%s4452_s0 + $0x7f0] sm:$0xff]  ;;  %v3250_v37 = vpack.c.bf16 %v2451_v34, %v2450_v33 }
 0x185   :  { %v3253_v38 = vpack.c.bf16 %v2469_v36, %v2468_v35 }
 0x18b   :  { %3150 = vmatpush3.bf16.xpose.msk.msra.mxu0 %vm3330_vm1, %v3148_v40  ;;  %v2453_v40 = vld [vmem:[%s4452_s0 + $0x778] sm:$0xff] }
 0x18c   :  { %3153 = vmatprep.subr.msk.bf16.mxu0 %vm3330_vm1, %v3151_v41  ;;  %v3256_v41 = vpack.c.bf16 %v2453_v40, %v2452_v39 }
 0x193   :  { %3156 = vmatpush3.bf16.xpose.msk.msra.mxu0 %vm3330_vm1, %v3154_v46 }
 0x194   :  { %3159 = vmatprep.subr.msk.bf16.mxu0 %vm3330_vm1, %v3157_v47 }
 0x199   :  { %v1683_v42 = vpop.f32.mrb[4].mxu1 }
 0x19a   :  { %v1685_v43 = vpop.f32.mrb[5].mxu1 }
 0x19b   :  { %3162 = vmatpush3.bf16.xpose.msk.msra.mxu0 %vm3330_vm1, %v3160_v52  ;;  %1965 = vmatprep.mubr.f32.mxu1 %v1685_v43  ;;  %v2602_v52 = vld [vmem:[%s4454_s2] ss:$0 sm:$0xff] }
 0x19c   :  { %3213 = vmatprep.subr.msk.bf16.mxu0 %vm3330_vm1, %v3211_v53  ;;  %1966 = vmatmul.mubr.f32.vlgmr.msra.gmra.mrb[8].mxu1 %v1683_v42 }
 0x19d   :  { %1972 = vmatpush1.xpose.msra.mxu1 %v4020_v3 }
 0x19e   :  { %2041 = vmatprep.subr.mxu1 %v4029_v6 }
 0x1a2   :  { %2806 = vmatmul.mubr.msk.f32.vlgmr.msra.gmra.mrb[6].mxu0 %vm152_vm0, %v3297_v7 }
 0x1a3   :  { %3216 = vmatpush3.bf16.xpose.msk.msra.mxu0 %vm3330_vm1, %v3214_v58  ;;  %2873 = vmatprep.mubr.msk.f32.mxu0 %vm152_vm0, %v3297_v7 }
 0x1a4   :  { %3219 = vmatprep.subr.msk.bf16.mxu0 %vm3330_vm1, %v3217_v59 }
 0x1ab   :  { %3222 = vmatpush3.bf16.xpose.msk.msra.mxu0 %vm3330_vm1, %v3220_v9 }
 0x1ac   :  { %3225 = vmatprep.subr.msk.bf16.mxu0 %vm3330_vm1, %v3223_v10 }
 0x1b3   :  { %3228 = vmatpush3.bf16.xpose.msk.msra.mxu0 %vm3330_vm1, %v3226_v11 }
 0x1b4   :  { %3231 = vmatprep.subr.msk.bf16.mxu0 %vm3330_vm1, %v3229_v12 }
 0x1bb   :  { %3234 = vmatpush3.bf16.xpose.msk.msra.mxu0 %vm3330_vm1, %v3232_v17 }
 0x1bc   :  { %3237 = vmatprep.subr.msk.bf16.mxu0 %vm3330_vm1, %v3235_v20 }
 0x1c3   :  { %3240 = vmatpush3.bf16.xpose.msk.msra.mxu0 %vm3330_vm1, %v3238_v25 }
 0x1c4   :  { %3243 = vmatprep.subr.msk.bf16.mxu0 %vm3330_vm1, %v3241_v26 }
 0x1cb   :  { %3246 = vmatpush3.bf16.xpose.msk.msra.mxu0 %vm3330_vm1, %v3244_v31 }
 0x1cc   :  { %3249 = vmatprep.subr.msk.bf16.mxu0 %vm3330_vm1, %v3247_v32 }
 0x1d3   :  { %3252 = vmatpush3.bf16.xpose.msk.msra.mxu0 %vm3330_vm1, %v3250_v37 }
 0x1d4   :  { %3255 = vmatprep.subr.msk.bf16.mxu0 %vm3330_vm1, %v3253_v38 }
 0x1d9   :  { %v1825_v44 = vpop.f32.mrb[6].mxu1 }
 0x1da   :  { %v1827_v45 = vpop.f32.mrb[7].mxu1 }
 0x1db   :  { %3258 = vmatpush3.bf16.xpose.msk.msra.mxu0 %vm3330_vm1, %v3256_v41 }
 0x1e2   :  { %2874 = vmatmul.mubr.msk.f32.vlgmr.msra.gmra.mrb[8].mxu0 %vm152_vm0, %v3297_v7 }
 0x235   :  { %v1100_v46 = vpop.f32.mrb[4].mxu0 }
 0x236   :  { %v1102_v47 = vpop.f32.mrb[5].mxu0 }
 0x275   :  { %v1754_v48 = vpop.f32.mrb[6].mxu0 }
 0x276   :  { %v1756_v49 = vpop.f32.mrb[7].mxu0 }
 0x277   :  { %2035 = vmatprep.mubr.f32.mxu1 %v1756_v49 }
 0x278   :  { %2036 = vmatmul.mubr.f32.vlgmr.msra.gmra.mrb[8].mxu1 %v1754_v48 }
 0x279   :  { %2042 = vmatpush1.xpose.msra.mxu1 %v4050_v18  ;;  %2105 = vmatprep.mubr.f32.mxu1 %v1827_v45 }
 0x27a   :  { %2111 = vmatprep.subr.mxu1 %v4057_v19 }
 0x280   :  { %2106 = vmatmul.mubr.f32.vlgmr.msra.gmra.mrb[8].mxu1 %v1825_v44 }
 0x281   :  { %2112 = vmatpush1.xpose.msra.mxu1 %v4169_v60 }
 0x2b5   :  { %v1896_v4 = vpop.f32.mrb[8].mxu0 }
 0x2b6   :  { %v1898_v7 = vpop.f32.mrb[9].mxu0 }
 0x2b7   :  { %2175 = vmatprep.mubr.f32.mxu1 %v1898_v7 }
 0x2b8   :  { %2176 = vmatmul.mubr.f32.vlgmr.msra.gmra.mrb[8].mxu1 %v1896_v4 }
 0x38b   :  { %v2177_v3 = vpop.f32.mrb[8].mxu1 }
 0x38c   :  { %v2182_v6 = vrot.slane %v2177_v3, 7  ;;  %v2179_v50 = vpop.f32.mrb[9].mxu1 }
 0x38e   :  { %v2185_v51 = vsel %vm2184_vm2, %v1100_v46, %v2182_v6 }
 0x38f   :  { %v2186_v18 = vmul.f32 0.015625, %v2185_v51 }
 0x391   :  { %v2193_v19 = vadd.f32 %v2602_v52, %v2186_v18 }
 0x393   :  { %2195 = vst.msk [vmem:[#allocation2] sm:$0x3] %vm2194_vm3, %v2193_v19 }
 0x394   :  { %3284 = shalt.err (!%p3281_p4)
}
 0x395   :  { %s3285_s28 = scalar_lea.hbm %s4455_s3, 32 }
 0x396   :  { %p3286_p5 = scmp.ne.s32.totalorder %s4455_s3, %s3285_s28  ;;  %p3289_p6 = scmp.lt.u32.totalorder %s3285_s28, %s4455_s3 }
 0x398   :  { %p3291_p7 = pnand %p3289_p6, %p3286_p5 }
 0x39a   :  { %3294 = shalt.err (!%p3291_p7)
}
 0x39b   :  { %2205 = dma.vmem_to_hbm [thread:$0]  %s2203_s24, 32, %s4455_s3, [#allocation3]  }
 0x39c   :  { %3295 = dma.done.wait [#allocation3], 32  }
 0x39d   :  { %3296 = vsyncadd [#allocation3], 4294967264 }
 0x39e   :  { %2209 = vsyncpa [#allocation3], 1 }

</bundles_post_ra>
